<compile_context>
chip_gen: v6e
topology: v6e:2x2x1
jax: 0.10.0
libtpu: 0.0.40
codegen_flags: <defaults>
</compile_context>

<pallas_src>
import jax
import jax.numpy as jnp
from jax.experimental import pallas as pl
from jax.experimental.pallas import tpu as pltpu

SEQ_LEN = 22  # fixed by the module: nn.Parameter(torch.zeros(1, 22, hidden))

_MAX_TILE_BYTES = 4 << 20          # per-tile cap (review: >4 MiB only eats VMEM)
_V5E_SCOPED_VMEM = 16 << 20        # smallest scoped-VMEM default across gens
_VMEM_LIMIT_CAP = 32 << 20         # never request more than v7x's scoped default


def _pos_enc_kernel(x_ref, pos_ref, o_ref):
    # x_ref:   (TB, S*H) tile of the flattened input
    # pos_ref: (1,  S*H) flattened position embeddings (VMEM-resident each step)
    # Single whole-block VPU add; the pos row broadcasts over the TB sublane rows.
    # TODO(synk): training-mode dropout (pltpu.prng_seed + stateful_bernoulli with
    #             per-block seed derivation) not emitted; this matches module.eval().
    o_ref[...] = x_ref[...] + pos_ref[...]


def _pick_tb(batch, row_bytes, itemsize, target_tile_bytes):
    """Pick the batch-tile row count.

    Dtype-aware sublane quantum, >=2 grid steps when batch allows (v7x megacore),
    and preference for an exact divisor of `batch` (no ragged trailing block).
    """
    q = {4: 8, 2: 16, 1: 32}.get(itemsize, 8)  # sublane packing quantum
    budget = min(int(target_tile_bytes), _MAX_TILE_BYTES)
    tb = max((budget // row_bytes) // q * q, q)

    if batch >= 2 * q:
        # Keep at least 2 grid steps so both v7x TensorCores participate.
        half = -(-batch // 2)           # cdiv(batch, 2)
        half_q = -(-half // q) * q      # round up to the sublane quantum
        tb = min(tb, half_q)
        # Prefer the largest multiple of q <= tb that divides batch exactly.
        for cand in range(tb, q - 1, -q):
            if batch % cand == 0:
                return cand
        return tb                       # ragged last block via cdiv grid
    # Tiny batch: one full-extent block (full-extent sublane dim is always legal).
    return batch


def positional_encoding_v(x, position_embeddings, *,
                          target_tile_bytes=2 << 20, donate_x=False):
    """x: (B, 22, H); position_embeddings: (1, 22, H). Returns x + pos (eval-mode dropout)."""
    B, S, H = x.shape
    assert S == SEQ_LEN
    assert position_embeddings.shape == (1, S, H)
    SH = S * H

    # Contiguous reshapes: free for default row-major layouts (no data movement).
    x2 = x.reshape(B, SH)
    pos2 = position_embeddings.reshape(1, SH)

    itemsize = jnp.dtype(x.dtype).itemsize
    row_bytes = SH * itemsize
    tb = _pick_tb(B, row_bytes, itemsize, target_tile_bytes)

    grid = (pl.cdiv(B, tb),)

    # VMEM footprint: x + out tiles double-buffered, plus the resident pos row.
    tile_bytes = tb * row_bytes
    pos_bytes = SH * jnp.dtype(position_embeddings.dtype).itemsize
    vmem_need = 4 * tile_bytes + 2 * pos_bytes + (1 << 20)  # headroom
    compiler_kwargs = dict(dimension_semantics=("parallel",))
    if vmem_need > _V5E_SCOPED_VMEM:
        compiler_kwargs["vmem_limit_bytes"] = min(vmem_need, _VMEM_LIMIT_CAP)

    call_kwargs = {}
    if donate_x:
        # Reuse x's HBM buffer for the output when the caller no longer needs x.
        call_kwargs["input_output_aliases"] = {0: 0}

    out2 = pl.pallas_call(
        _pos_enc_kernel,
        out_shape=jax.ShapeDtypeStruct((B, SH), x.dtype),
        grid=grid,
        in_specs=[
            pl.BlockSpec((tb, SH), lambda b: (b, 0)),  # batched slab of x
            pl.BlockSpec((1, SH), lambda b: (0, 0)),   # pos-emb row, VMEM-resident
        ],
        out_specs=pl.BlockSpec((tb, SH), lambda b: (b, 0)),
        compiler_params=pltpu.CompilerParams(**compiler_kwargs),
        **call_kwargs,
    )(x2, pos2)

    return out2.reshape(B, S, H)


if __name__ == "__main__":
    H = 32  # small hidden size for the self-test

    key = jax.random.PRNGKey(0)
    kx1, kx2, kx3, kp = jax.random.split(key, 4)

    # Module __init__ zero-inits the parameter; use random values so the
    # broadcast-add is actually exercised.
    pos_f32 = jax.random.normal(kp, (1, SEQ_LEN, H), dtype=jnp.float32)

    # Case 1: tiny batch -> single full-extent block (grid of 1).
    B1 = 2
    x1 = jax.random.normal(kx1, (B1, SEQ_LEN, H), dtype=jnp.float32)
    out1 = jax.block_until_ready(positional_encoding_v(x1, pos_f32))
    ref1 = x1 + pos_f32
    assert out1.shape == (B1, SEQ_LEN, H)
    assert jnp.allclose(out1, ref1, atol=1e-6, rtol=1e-6)

    # Case 2: larger batch, small tile budget -> multi-step tiled path
    # (TB=8 divides B=32 exactly, grid of 4 "parallel" steps), with x aliased
    # to the output (reference computed beforehand).
    B2 = 32
    x2 = jax.random.normal(kx2, (B2, SEQ_LEN, H), dtype=jnp.float32)
    ref2 = x2 + pos_f32
    out2 = jax.block_until_ready(
        positional_encoding_v(x2, pos_f32, target_tile_bytes=16 * 1024, donate_x=True)
    )
    assert out2.shape == (B2, SEQ_LEN, H)
    assert jnp.allclose(out2, ref2, atol=1e-6, rtol=1e-6)

    # Case 3: bf16 path -> dtype-aware sublane quantum (TB multiple of 16),
    # TB=16 divides B=48 exactly, grid of 3 steps.
    B3 = 48
    x3 = jax.random.normal(kx3, (B3, SEQ_LEN, H), dtype=jnp.float32).astype(jnp.bfloat16)
    pos_bf16 = pos_f32.astype(jnp.bfloat16)
    out3 = jax.block_until_ready(
        positional_encoding_v(x3, pos_bf16, target_tile_bytes=16 * 1024)
    )
    ref3 = x3 + pos_bf16
    assert out3.shape == (B3, SEQ_LEN, H)
    assert out3.dtype == jnp.bfloat16
    assert jnp.allclose(out3.astype(jnp.float32), ref3.astype(jnp.float32),
                        atol=1e-6, rtol=1e-6)

    print("KERNEL_OK")
</pallas_src>

<mosaic_0001>
module attributes {stable_mosaic.version = 11 : i64} {
  func.func @_pos_enc_kernel(%arg0: i32, %arg1: memref<2x704xf32, #tpu.memory_space<vmem>>, %arg2: memref<1x704xf32, #tpu.memory_space<vmem>>, %arg3: memref<2x704xf32, #tpu.memory_space<vmem>>) attributes {dimension_semantics = [#tpu.dimension_semantics<parallel>], iteration_bounds = array<i64: 1>, scalar_prefetch = 0 : i64, scratch_operands = 0 : i64, tpu.core_type = #tpu.core_type<tc>, window_params = [{transform_indices = @transform_0, window_bounds = array<i64: 2, 704>}, {pipeline_mode = #tpu.pipeline_mode<synchronous>, transform_indices = @transform_1, window_bounds = array<i64: 1, 704>}, {transform_indices = @transform_2, window_bounds = array<i64: 2, 704>}]} {
    %c0 = arith.constant 0 : index
    %c0_0 = arith.constant 0 : index
    %0 = vector.load %arg1[%c0, %c0_0] : memref<2x704xf32, #tpu.memory_space<vmem>>, vector<2x704xf32>
    %c0_1 = arith.constant 0 : index
    %c0_2 = arith.constant 0 : index
    %1 = vector.load %arg2[%c0_1, %c0_2] : memref<1x704xf32, #tpu.memory_space<vmem>>, vector<1x704xf32>
    %2 = vector.broadcast %1 : vector<1x704xf32> to vector<2x704xf32>
    %3 = arith.addf %0, %2 : vector<2x704xf32>
    %c0_3 = arith.constant 0 : index
    %c0_4 = arith.constant 0 : index
    %4 = vector.load %arg3[%c0_3, %c0_4] : memref<2x704xf32, #tpu.memory_space<vmem>>, vector<2x704xf32>
    tpu.vector_store %arg3[%c0_3, %c0_4], %3 {strides = array<i32>} : memref<2x704xf32, #tpu.memory_space<vmem>>, vector<2x704xf32>,
    return
  }
  func.func @transform_0(%arg0: i32) -> (i32, i32) {
    %c0_i32 = arith.constant 0 : i32
    %c0_i32_0 = arith.constant 0 : i32
    return %arg0, %c0_i32 : i32, i32
  }
  func.func @transform_1(%arg0: i32) -> (i32, i32) {
    %c0_i32 = arith.constant 0 : i32
    %c0_i32_0 = arith.constant 0 : i32
    %c0_i32_1 = arith.constant 0 : i32
    return %c0_i32, %c0_i32_0 : i32, i32
  }
  func.func @transform_2(%arg0: i32) -> (i32, i32) {
    %c0_i32 = arith.constant 0 : i32
    %c0_i32_0 = arith.constant 0 : i32
    return %arg0, %c0_i32 : i32, i32
  }
}

</mosaic_0001>

<bundles_post_ra>
// kernel: tpu_custom_call.1
= control target key start
LH: loop header
LB: loop body
LE: loop exit
PB: predicated region body
PF: predicated region fallthrough
CT: control target
= control target key end

     0   :  { %7 = vsyncpa [#allocation3], 0  ;;  %s212_s0 = inlined_call_operand.hbm [shape: f32[2,704], index: 0, kind: input, shape index: {}]   ;;  %s213_s1 = inlined_call_operand.hbm [shape: f32[1,704], index: 1, kind: input, shape index: {}]   ;;  %s214_s2 = inlined_call_operand.hbm [shape: f32[2,704], index: 2, kind: output, shape index: {}]  }
   0x1   :  { %8 = vsyncpa [#allocation6], 0 }
   0x2   :  { %9 = vsyncpa [#allocation4], 0  ;;  %s184_s9 = smov [#allocation2]   ;;  %s185_s11 = smov [#allocation5]  }
   0x3   :  { %s16_s10 = sshll.u32 %s184_s9, 4  ;;  %s26_s12 = sshll.u32 %s185_s11, 4  ;;  %s17_s10 = int_to_ptr.vmem [resolvable:$true] %s16_s10  ;;  %s27_s12 = int_to_ptr.vmem [resolvable:$true] %s26_s12 }
   0x4   :  { %s126_s13 = scalar_lea.vmem %s17_s10, 192  ;;  %p131_p1 = scmp.lt.s32.totalorder %s17_s10, %s17_s10 }
   0x5   :  { %p127_p0 = scmp.ne.s32.totalorder %s17_s10, %s126_s13  ;;  %p132_p2 = scmp.lt.s32.totalorder %s126_s13, %s126_s13 }
   0x7   :  { %p133_p3 = por %p132_p2, %p131_p1 }
   0x9   :  { %p134_p4 = pnand %p133_p3, %p127_p0 }
   0xb   :  { %137 = shalt.err (!%p134_p4)
}
   0xc   :  { %19 = dma.hbm_to_vmem [thread:$0]  %s212_s0, 192, %s17_s10, [#allocation3]  }
   0xd   :  { %s146_s16 = scalar_lea.vmem %s27_s12, 96  ;;  %p151_p6 = scmp.lt.s32.totalorder %s27_s12, %s27_s12 }
   0xe   :  { %p147_p5 = scmp.ne.s32.totalorder %s27_s12, %s146_s16  ;;  %p152_p7 = scmp.lt.s32.totalorder %s146_s16, %s146_s16 }
  0x10   :  { %p153_p8 = por %p152_p7, %p151_p6 }
  0x12   :  { %p154_p9 = pnand %p153_p8, %p147_p5 }
  0x14   :  { %157 = shalt.err (!%p154_p9)
}
  0x15   :  { %29 = dma.hbm_to_vmem [thread:$0]  %s213_s1, 96, %s27_s12, [#allocation6]  }
  0x16   :  { %178 = dma.done.wait [#allocation3], 192  }
  0x17   :  { %179 = vsyncadd [#allocation3], 4294967104 }
  0x18   :  { %180 = dma.done.wait [#allocation6], 96  }
  0x19   :  { %181 = vsyncadd [#allocation6], 4294967200  ;;  %v40_v0 = vlaneseq  ;;  %v186_v1 = vmov 1983009808   ;;  %v38_v11 = vld [vmem:[#allocation5] sm:$0x3f] }
  0x1a   :  { %v67_v2 = vunpack.c.l.s4 %v186_v1  ;;  %vm94_vm0 = vcmask 1041408   ;;  %vm95_vm1 = vcmask 519170   ;;  %v37_v24 = vld [vmem:[#allocation2 + $0x8] sm:$0xf]  ;;  %v36_v25 = vld [vmem:[#allocation2] sm:$0xff]  ;;  %s187_s0 = smov [#allocation7]  }
  0x1b   :  { %v41_v3 = vshrl.u32 %v40_v0, 7  ;;  %s104_s1 = sshll.u32 %s187_s0, 4  ;;  %vm96_vm2 = vmor %vm95_vm1, %vm94_vm0  ;;  %s105_s1 = int_to_ptr.vmem [resolvable:$true] %s104_s1 }
  0x1c   :  { %v68_v4 = vunpack.c.0.s8 %v67_v2  ;;  %s158_s19 = scalar_lea.vmem %s105_s1, 192  ;;  %p163_p11 = scmp.lt.s32.totalorder %s105_s1, %s105_s1 }
  0x1d   :  { %v42_v5 = vsub.s32 0, %v41_v3  ;;  %v46_v6 = vsub.s32 1, %v41_v3  ;;  %v50_v7 = vsub.s32 2, %v41_v3  ;;  %v54_v8 = vsub.s32 3, %v41_v3  ;;  %p159_p10 = scmp.ne.s32.totalorder %s105_s1, %s158_s19  ;;  %p164_p12 = scmp.lt.s32.totalorder %s158_s19, %s158_s19 }
  0x1e   :  { %v58_v9 = vsub.s32 4, %v41_v3  ;;  %v62_v10 = vsub.s32 5, %v41_v3  ;;  %v71_v12 = vsub.s32 %v68_v4, %v41_v3 }
  0x1f   :  { %v43_v13 = vrot.slane %v38_v11, %v42_v5  ;;  %v47_v14 = vrot.slane %v38_v11, %v46_v6  ;;  %v51_v15 = vrot.slane %v38_v11, %v50_v7  ;;  %v55_v16 = vrot.slane %v38_v11, %v54_v8  ;;  %p165_p13 = por %p164_p12, %p163_p11 }
  0x20   :  { %v59_v17 = vrot.slane %v38_v11, %v58_v9  ;;  %v63_v18 = vrot.slane %v38_v11, %v62_v10 }
  0x21   :  { %v64_v19 = vcombine.low %v43_v13, %v47_v14  ;;  %v65_v20 = vcombine.low %v51_v15, %v55_v16  ;;  %p166_p0 = pnand %p165_p13, %p159_p10 }
  0x22   :  { %v81_v21 = vcombine.low %v59_v17, %v63_v18 }
  0x23   :  { %v72_v22 = vrot.slane %v64_v19, %v71_v12  ;;  %v79_v23 = vrot.slane %v65_v20, %v71_v12 }
  0x24   :  { %v88_v26 = vrot.slane %v81_v21, %v71_v12 }
  0x25   :  { %v80_v27 = vcombine.low %v72_v22, %v79_v23 }
  0x26   :  { %v92_v28 = vadd.f32 %v88_v26, %v37_v24 }
  0x27   :  { %v91_v29 = vadd.f32 %v80_v27, %v36_v25 }
  0x28   :  { %97 = vst.msk [vmem:[#allocation7 + $0x8] sm:$0xf] %vm96_vm2, %v92_v28 }
  0x29   :  { %93 = vst [vmem:[#allocation7] sm:$0xff] %v91_v29 }
  0x2a   :  { %169 = shalt.err (!%p166_p0)
}
  0x2b   :  { %107 = dma.vmem_to_hbm [thread:$0]  %s105_s1, 192, %s214_s2, [#allocation4]  }
  0x2c   :  { %182 = dma.done.wait [#allocation4], 192  }
  0x2d   :  { %183 = vsyncadd [#allocation4], 4294967104 }
  0x2e   :  { %111 = vsyncpa [#allocation3], 1 }
  0x2f   :  { %112 = vsyncpa [#allocation6], 1 }
  0x30   :  { %113 = vsyncpa [#allocation4], 1 }

</bundles_post_ra>
